<compile_context>
chip_gen: v6e
topology: v6e:2x2x1
jax: 0.10.0
libtpu: 0.0.40
codegen_flags: <defaults>
</compile_context>

<pallas_src>
import functools

import jax
import jax.numpy as jnp
from jax.experimental import pallas as pl
from jax.experimental.pallas import tpu as pltpu


# ----------------------------------------------------------------------------
# Best-effort hardware probing (every fallback is safe on all generations).
# ----------------------------------------------------------------------------
def _tpu_generation():
    try:
        kind = jax.devices()[0].device_kind.lower()
    except Exception:
        return 0
    for g in (7, 6, 5, 4):
        if (f"v{g}" in kind) or (f"tpu{g}" in kind) or (f"tpu {g}" in kind):
            return g
    return 0


def _vmem_capacity_bytes(gen):
    try:
        cap = int(pltpu.get_tpu_info().vmem_capacity_bytes)
        if cap > 0:
            return cap
    except Exception:
        pass
    return (64 << 20) if gen >= 7 else (128 << 20)


# ----------------------------------------------------------------------------
# Tuning helpers.
# ----------------------------------------------------------------------------
def _dot_config(dtype, s, gen):
    """Returns (dot operand dtype, matmul precision, lane-chunk cap).

    The cap keeps the permutation matmul below each generation's MXU:HBM
    balance point so the op remains HBM-bound.
    """
    # f32 bit-exactness REQUIRES precision=HIGHEST (6-pass MXU emulation);
    # HIGH/DEFAULT silently round the data - keep this guarded.
    f32_cap = 256 if gen == 6 else 128                    # v5e/v7x: stay HBM-bound
    lo_cap = (256 * s) if gen in (6, 7) else (128 * s)    # single-pass bf16
    if dtype == jnp.float32:
        return jnp.float32, jax.lax.Precision.HIGHEST, f32_cap
    if dtype == jnp.bfloat16:
        return jnp.bfloat16, jax.lax.Precision.DEFAULT, lo_cap
    if dtype in (jnp.int8, jnp.uint8):
        # int8 is exact in bf16; v7x's MXU has no integer datapath.
        return jnp.bfloat16, jax.lax.Precision.DEFAULT, lo_cap
    # f16 (not exact in bf16) and wider ints: exact through f32 HIGHEST.
    # TODO(synk): integer magnitudes >= 2^24 are not bit-exact through f32.
    return jnp.float32, jax.lax.Precision.HIGHEST, f32_cap


def _pick_chunk(w, s, cap):
    """Largest divisor of w that is a multiple of s and at most `cap` lanes."""
    cap = min(w, max(cap, s))
    for d in range(cap, s - 1, -1):
        if w % d == 0 and d % s == 0:
            return d
    return w


def _choose_tiles(c, ho, row_bytes, sublane, target_bytes):
    """Pick (channel_block, row_block) so one input block is ~target_bytes.

    row_block is a multiple of the sublane tile or equal to ho; channels are
    only blocked (>1) when whole-ho, tile-aligned blocks are used so the
    in-kernel (cb, th) -> (cb*th) flatten is layout-trivial.
    """
    max_rows = max(1, target_bytes // row_bytes)
    if max_rows >= ho and ho % sublane == 0:
        cb = min(c, max(1, max_rows // ho))
        while c % cb:
            cb -= 1
        return cb, ho
    if max_rows >= ho or ho <= sublane:
        return 1, ho
    th = min(ho, max_rows)
    th = max(sublane, (th // sublane) * sublane)
    return 1, min(th, ho)


# ----------------------------------------------------------------------------
# Kernel.
# ----------------------------------------------------------------------------
def _contract_kernel(e_ref, x_ref, o_ref, *, s, w, chunk, dot_dtype, precision):
    # e_ref: (chunk, chunk) constant 0/1 permutation matrix (VMEM-resident)
    # x_ref: (cb, th, s*w)  lanes [s1*w, s1*w+w) hold original row i*s + s1
    # o_ref: (s*s, cb, th, wo)
    cb, th, _ = x_ref.shape
    rows = cb * th
    cwo = chunk // s
    n_chunks = w // chunk
    e = e_ref[...]

    def do_chunk(s1, k0, j0):
        # seg[:, k] = original column (k0 + k) of input rows i*s + s1.
        seg = x_ref[:, :, pl.ds(s1 * w + k0, chunk)]
        seg = seg.reshape(rows, chunk).astype(dot_dtype)
        # MXU permutation: res[:, s2*cwo + j] = seg[:, s*j + s2].  Exactly one
        # non-zero product per output element -> bit-exact (f32 relies on
        # precision=HIGHEST; bf16/int8 are exact in a single native pass).
        res = jnp.dot(seg, e, preferred_element_type=jnp.float32,
                      precision=precision)
        res = res.astype(o_ref.dtype)
        for s2 in range(s):
            piece = res[:, s2 * cwo:(s2 + 1) * cwo].reshape(cb, th, cwo)
            o_ref[s1 * s + s2, :, :, pl.ds(j0, cwo)] = piece

    # TODO(synk): when w % 128 != 0 the s1>0 slices start lane-unaligned
    # (per-chunk relayout); a grid-level s1 split over a (b,c,ho,s,w) view
    # would remove it but needs a squeezed middle block dim.
    for s1 in range(s):                        # tiny static loop
        if n_chunks <= 8:
            for ki in range(n_chunks):         # fully unrolled for small w
                do_chunk(s1, ki * chunk, ki * cwo)
        else:
            # Large widths: bounded unrolling keeps vreg pressure / code size
            # sane instead of unrolling dozens of matmul+store groups.
            def body(ki, carry):
                k0 = pl.multiple_of(ki * chunk, chunk)
                j0 = pl.multiple_of(ki * cwo, cwo)
                do_chunk(s1, k0, j0)
                return carry
            jax.lax.fori_loop(0, n_chunks, body, 0, unroll=2)


# ----------------------------------------------------------------------------
# Wrapper.
# ----------------------------------------------------------------------------
def contract(x, gain=2):
    b, c, h, w = x.shape
    s = int(gain)
    if h % s or w % s:
        raise ValueError(f"spatial dims ({h},{w}) must be divisible by gain={s}")
    ho, wo = h // s, w // s
    sw = s * w
    itemsize = x.dtype.itemsize
    sublane = max(8, 8 * (4 // itemsize))      # 8 (f32) / 16 (bf16) / 32 (int8)

    gen = _tpu_generation()
    vmem_cap = _vmem_capacity_bytes(gen)
    dot_dtype, precision, chunk_cap = _dot_config(x.dtype, s, gen)
    chunk = _pick_chunk(w, s, chunk_cap)
    cwo = chunk // s

    # Bigger blocks on 128-MiB-VMEM parts (v5e/v6e) amortize the ~0.35us/step
    # grid overhead; v7x (64 MiB VMEM) keeps ~4 MiB blocks.
    target_bytes = (12 << 20) if vmem_cap >= (128 << 20) else (4 << 20)
    cb, th = _choose_tiles(c, ho, sw * itemsize, sublane, target_bytes)

    # Megacore balance: make sure there are >=2 grid blocks so both v7x
    # TensorCores (and the pipeline) get work.
    def _n_blocks(cb_, th_):
        return b * (c // cb_) * (-(-ho // th_))
    if _n_blocks(cb, th) < 2 and cb > 1:
        cb = 1
    if _n_blocks(cb, th) < 2 and ho >= 2 * sublane:
        th = max(sublane, ((ho // 2) // sublane) * sublane)

    # Free (bitcast) reshape: original row i*s+s1 lives at lanes
    # [s1*w, (s1+1)*w) of row i of this view - no HBM transpose.
    x_view = x.reshape(b, c, ho, sw)

    # 0/1 permutation matrix (built once, stays VMEM-resident: constant map).
    col = jnp.arange(chunk)[None, :]
    row = jnp.arange(chunk)[:, None]
    e = (row == s * (col % cwo) + col // cwo).astype(dot_dtype)

    in_block_bytes = cb * th * sw * itemsize
    out_block_bytes = s * s * cb * th * wo * itemsize
    need = 2 * (in_block_bytes + out_block_bytes) + (8 << 20)
    vmem_limit = int(min(vmem_cap * 3 // 4, max(need, 32 << 20)))

    grid = (b, c // cb, -(-ho // th))
    cost = pl.CostEstimate(flops=2 * x.size * chunk, transcendentals=0,
                           bytes_accessed=2 * x.size * itemsize)

    out = pl.pallas_call(
        functools.partial(_contract_kernel, s=s, w=w, chunk=chunk,
                          dot_dtype=dot_dtype, precision=precision),
        out_shape=jax.ShapeDtypeStruct((b, s * s, c, ho, wo), x.dtype),
        grid=grid,
        in_specs=[
            pl.BlockSpec((chunk, chunk), lambda bi, ci, ri: (0, 0)),
            pl.BlockSpec((None, cb, th, sw), lambda bi, ci, ri: (bi, ci, ri, 0)),
        ],
        out_specs=pl.BlockSpec((None, s * s, cb, th, wo),
                               lambda bi, ci, ri: (bi, 0, ci, ri, 0)),
        compiler_params=pltpu.CompilerParams(
            dimension_semantics=("parallel", "parallel", "parallel"),
            vmem_limit_bytes=vmem_limit,
        ),
        cost_estimate=cost,
    )(e, x_view)

    # Free reshape: channel index (s1*s + s2)*c + ch matches torch's
    # permute(0, 3, 5, 1, 2, 4).contiguous().view(b, c*s*s, ho, wo).
    return out.reshape(b, s * s * c, ho, wo)


def _reference_contract(x, s):
    # Pure-JAX replica of the PyTorch forward (NCHW).
    b, c, h, w = x.shape
    x6 = x.reshape(b, c, h // s, s, w // s, s)
    xp = jnp.transpose(x6, (0, 3, 5, 1, 2, 4))
    return xp.reshape(b, c * s * s, h // s, w // s)


if __name__ == "__main__":
    key = jax.random.PRNGKey(0)
    k0, k1, k2 = jax.random.split(key, 3)

    # Primary check: canonical small shape, f32, gain=2.
    x = jax.random.normal(k0, (2, 4, 16, 16), dtype=jnp.float32)
    out = jax.block_until_ready(contract(x, gain=2))
    ref = _reference_contract(x, 2)
    assert out.shape == (2, 16, 8, 8), out.shape
    assert out.dtype == x.dtype, out.dtype
    assert jnp.allclose(out, ref, rtol=1e-6, atol=1e-6), "f32 gain=2 mismatch"

    # gain=4 path.
    x4 = jax.random.normal(k1, (2, 2, 16, 16), dtype=jnp.float32)
    out4 = jax.block_until_ready(contract(x4, gain=4))
    assert jnp.allclose(out4, _reference_contract(x4, 4),
                        rtol=1e-6, atol=1e-6), "f32 gain=4 mismatch"

    # bf16 single-pass MXU path.
    xb = jax.random.normal(k2, (2, 4, 32, 64), dtype=jnp.bfloat16)
    outb = jax.block_until_ready(contract(xb, gain=2))
    assert jnp.allclose(outb, _reference_contract(xb, 2),
                        rtol=1e-2, atol=1e-2), "bf16 gain=2 mismatch"

    print("KERNEL_OK")
</pallas_src>

<mosaic_0001>
module attributes {stable_mosaic.version = 11 : i64} {
  func.func @_contract_kernel(%arg0: i32, %arg1: i32, %arg2: i32, %arg3: memref<16x16xf32, #tpu.memory_space<vmem>>, %arg4: memref<1x4x8x32xf32, #tpu.memory_space<vmem>>, %arg5: memref<1x4x4x8x8xf32, #tpu.memory_space<vmem>>) attributes {dimension_semantics = [#tpu.dimension_semantics<parallel>, #tpu.dimension_semantics<parallel>, #tpu.dimension_semantics<parallel>], iteration_bounds = array<i64: 2, 1, 1>, scalar_prefetch = 0 : i64, scratch_operands = 0 : i64, tpu.core_type = #tpu.core_type<tc>, window_params = [{pipeline_mode = #tpu.pipeline_mode<synchronous>, transform_indices = @transform_0, window_bounds = array<i64: 16, 16>}, {transform_indices = @transform_1, window_bounds = array<i64: 1, 4, 8, 32>}, {transform_indices = @transform_2, window_bounds = array<i64: 1, 4, 4, 8, 8>}]} {
    %c0 = arith.constant 0 : index
    %c0_0 = arith.constant 0 : index
    %0 = vector.load %arg3[%c0, %c0_0] : memref<16x16xf32, #tpu.memory_space<vmem>>, vector<16x16xf32>
    %c0_1 = arith.constant 0 : index
    %c0_2 = arith.constant 0 : index
    %c0_3 = arith.constant 0 : index
    %c0_4 = arith.constant 0 : index
    %1 = vector.load %arg4[%c0_1, %c0_2, %c0_3, %c0_4] : memref<1x4x8x32xf32, #tpu.memory_space<vmem>>, vector<1x4x8x16xf32>
    %2 = vector.shape_cast %1 : vector<1x4x8x16xf32> to vector<4x8x16xf32>
    %3 = vector.shape_cast %2 : vector<4x8x16xf32> to vector<32x16xf32>
    %cst = arith.constant dense<0.000000e+00> : vector<32x16xf32>
    %4 = tpu.matmul %3, %0, %cst {dimension_numbers = #tpu.dot_dimension_numbers<[1], [0], [0], [1], [0, 0, 1, 1], [], []>, precision = #tpu.contract_precision<fp32>} : vector<32x16xf32>, vector<16x16xf32>, vector<32x16xf32> -> vector<32x16xf32>
    %5 = vector.extract_strided_slice %4 {offsets = [0, 0], sizes = [32, 8], strides = [1, 1]} : vector<32x16xf32> to vector<32x8xf32>
    %6 = vector.shape_cast %5 : vector<32x8xf32> to vector<4x8x8xf32>
    %c0_5 = arith.constant 0 : index
    %c0_6 = arith.constant 0 : index
    %c0_7 = arith.constant 0 : index
    %c0_8 = arith.constant 0 : index
    %c0_9 = arith.constant 0 : index
    %7 = vector.load %arg5[%c0_5, %c0_6, %c0_7, %c0_8, %c0_9] : memref<1x4x4x8x8xf32, #tpu.memory_space<vmem>>, vector<1x1x4x8x8xf32>
    %8 = vector.shape_cast %7 : vector<1x1x4x8x8xf32> to vector<4x8x8xf32>
    %9 = vector.shape_cast %6 : vector<4x8x8xf32> to vector<1x1x4x8x8xf32>
    tpu.vector_store %arg5[%c0_5, %c0_6, %c0_7, %c0_8, %c0_9], %9 {strides = array<i32>} : memref<1x4x4x8x8xf32, #tpu.memory_space<vmem>>, vector<1x1x4x8x8xf32>,
    %10 = vector.extract_strided_slice %4 {offsets = [0, 8], sizes = [32, 8], strides = [1, 1]} : vector<32x16xf32> to vector<32x8xf32>
    %11 = vector.shape_cast %10 : vector<32x8xf32> to vector<4x8x8xf32>
    %c0_10 = arith.constant 0 : index
    %c1 = arith.constant 1 : index
    %c0_11 = arith.constant 0 : index
    %c0_12 = arith.constant 0 : index
    %c0_13 = arith.constant 0 : index
    %12 = vector.load %arg5[%c0_10, %c1, %c0_11, %c0_12, %c0_13] : memref<1x4x4x8x8xf32, #tpu.memory_space<vmem>>, vector<1x1x4x8x8xf32>
    %13 = vector.shape_cast %12 : vector<1x1x4x8x8xf32> to vector<4x8x8xf32>
    %14 = vector.shape_cast %11 : vector<4x8x8xf32> to vector<1x1x4x8x8xf32>
    tpu.vector_store %arg5[%c0_10, %c1, %c0_11, %c0_12, %c0_13], %14 {strides = array<i32>} : memref<1x4x4x8x8xf32, #tpu.memory_space<vmem>>, vector<1x1x4x8x8xf32>,
    %c0_14 = arith.constant 0 : index
    %c0_15 = arith.constant 0 : index
    %c0_16 = arith.constant 0 : index
    %c16 = arith.constant 16 : index
    %15 = vector.load %arg4[%c0_14, %c0_15, %c0_16, %c16] : memref<1x4x8x32xf32, #tpu.memory_space<vmem>>, vector<1x4x8x16xf32>
    %16 = vector.shape_cast %15 : vector<1x4x8x16xf32> to vector<4x8x16xf32>
    %17 = vector.shape_cast %16 : vector<4x8x16xf32> to vector<32x16xf32>
    %cst_17 = arith.constant dense<0.000000e+00> : vector<32x16xf32>
    %18 = tpu.matmul %17, %0, %cst_17 {dimension_numbers = #tpu.dot_dimension_numbers<[1], [0], [0], [1], [0, 0, 1, 1], [], []>, precision = #tpu.contract_precision<fp32>} : vector<32x16xf32>, vector<16x16xf32>, vector<32x16xf32> -> vector<32x16xf32>
    %19 = vector.extract_strided_slice %18 {offsets = [0, 0], sizes = [32, 8], strides = [1, 1]} : vector<32x16xf32> to vector<32x8xf32>
    %20 = vector.shape_cast %19 : vector<32x8xf32> to vector<4x8x8xf32>
    %c0_18 = arith.constant 0 : index
    %c2 = arith.constant 2 : index
    %c0_19 = arith.constant 0 : index
    %c0_20 = arith.constant 0 : index
    %c0_21 = arith.constant 0 : index
    %21 = vector.load %arg5[%c0_18, %c2, %c0_19, %c0_20, %c0_21] : memref<1x4x4x8x8xf32, #tpu.memory_space<vmem>>, vector<1x1x4x8x8xf32>
    %22 = vector.shape_cast %21 : vector<1x1x4x8x8xf32> to vector<4x8x8xf32>
    %23 = vector.shape_cast %20 : vector<4x8x8xf32> to vector<1x1x4x8x8xf32>
    tpu.vector_store %arg5[%c0_18, %c2, %c0_19, %c0_20, %c0_21], %23 {strides = array<i32>} : memref<1x4x4x8x8xf32, #tpu.memory_space<vmem>>, vector<1x1x4x8x8xf32>,
    %24 = vector.extract_strided_slice %18 {offsets = [0, 8], sizes = [32, 8], strides = [1, 1]} : vector<32x16xf32> to vector<32x8xf32>
    %25 = vector.shape_cast %24 : vector<32x8xf32> to vector<4x8x8xf32>
    %c0_22 = arith.constant 0 : index
    %c3 = arith.constant 3 : index
    %c0_23 = arith.constant 0 : index
    %c0_24 = arith.constant 0 : index
    %c0_25 = arith.constant 0 : index
    %26 = vector.load %arg5[%c0_22, %c3, %c0_23, %c0_24, %c0_25] : memref<1x4x4x8x8xf32, #tpu.memory_space<vmem>>, vector<1x1x4x8x8xf32>
    %27 = vector.shape_cast %26 : vector<1x1x4x8x8xf32> to vector<4x8x8xf32>
    %28 = vector.shape_cast %25 : vector<4x8x8xf32> to vector<1x1x4x8x8xf32>
    tpu.vector_store %arg5[%c0_22, %c3, %c0_23, %c0_24, %c0_25], %28 {strides = array<i32>} : memref<1x4x4x8x8xf32, #tpu.memory_space<vmem>>, vector<1x1x4x8x8xf32>,
    return
  }
  func.func @transform_0(%arg0: i32, %arg1: i32, %arg2: i32) -> (i32, i32) {
    %c0_i32 = arith.constant 0 : i32
    %c0_i32_0 = arith.constant 0 : i32
    %c0_i32_1 = arith.constant 0 : i32
    return %c0_i32, %c0_i32_0 : i32, i32
  }
  func.func @transform_1(%arg0: i32, %arg1: i32, %arg2: i32) -> (i32, i32, i32, i32) {
    %c0_i32 = arith.constant 0 : i32
    %c0_i32_0 = arith.constant 0 : i32
    return %arg0, %arg1, %arg2, %c0_i32 : i32, i32, i32, i32
  }
  func.func @transform_2(%arg0: i32, %arg1: i32, %arg2: i32) -> (i32, i32, i32, i32, i32) {
    %c0_i32 = arith.constant 0 : i32
    %c0_i32_0 = arith.constant 0 : i32
    %c0_i32_1 = arith.constant 0 : i32
    return %arg0, %c0_i32, %arg1, %arg2, %c0_i32_0 : i32, i32, i32, i32, i32
  }
}

</mosaic_0001>

<bundles_post_ra>
// kernel: tpu_custom_call.1
= control target key start
LH: loop header
LB: loop body
LE: loop exit
PB: predicated region body
PF: predicated region fallthrough
CT: control target
= control target key end

     0   :  { %7 = vsyncpa [#allocation3], 0  ;;  %s2390_s0 = inlined_call_operand.hbm [shape: f32[16,16], index: 0, kind: input, shape index: {}]   ;;  %s2391_s1 = inlined_call_operand.hbm [shape: f32[2,4,8,32], index: 1, kind: input, shape index: {}]   ;;  %s2392_s2 = inlined_call_operand.hbm [shape: f32[2,4,4,8,8], index: 2, kind: output, shape index: {}]  }
   0x1   :  { %8 = vsyncpa [#allocation6], 0 }
   0x2   :  { %10 = vsyncpa [#allocation6 + $0x1], 0 }
   0x3   :  { %11 = vsyncpa [#allocation4], 0 }
   0x4   :  { %13 = vsyncpa [#allocation4 + $0x1], 0  ;;  %s2067_s9 = smov 0   ;;  %s2069_s10 = smov 0  }
   0x5   :  { %s2071_s11 = smov 0   ;;  %s2073_s12 = smov 0  }
   0x6   :  { %s2075_s13 = smov 0   ;;  %s2077_s14 = smov 0  }
   0x7 LB: > { %s1601_s15 = sadd.s32 4294967295, %s2041_s14   ;;  %s1602_s16 = sadd.s32 4294967294, %s2041_s14   ;;  %s2041_s14 = sphi %s2077_s14, %s19_s14   ;;  %s2037_s13 = sphi %s2075_s13, %s2412_s13   ;;  %s2033_s12 = sphi %s2073_s12, %s2411_s12   ;;  %s2029_s11 = sphi %s2071_s11, %s2410_s11   ;;  %s2025_s10 = sphi %s2069_s10, %s2409_s10   ;;  %s2021_s9 = sphi %s2067_s9, %s2408_s9  }
   0x8   : > { %p83_p0 = scmp.ne.s32.totalorder %s2025_s10, %s2021_s9  ;;  %p2101_p1 = scmp.eq.s32.totalorder %s1601_s15, 0 }
   0x9   : > { %p2105_p2 = scmp.eq.s32.totalorder %s1601_s15, 1  ;;  %p117_p3 = scmp.eq.s32.totalorder %s1602_s16, 1 }
   0xa   : > { %p2111_p4 = por %p2101_p1, %p83_p0  ;;  %p1603_p5 = scmp.ge.s32.totalorder %s2041_s14, 1 }
   0xb   : > { %p2116_p6 = por %p117_p3, %p83_p0  ;;  %p124_p7 = scmp.lt.s32.totalorder %s2041_s14, 3 }
   0xc   : > { %s2397_s19 = scalar_select %p2111_p4, 1, 0 }
   0xd   : > { %s2398_s20 = scalar_select %p2116_p6, 1, 0 }
   0xe   : > { %p2121_p8 = pnand %p1603_p5, %p124_p7  ;;  %s2043_s22 = smov [#allocation2]  }
   0xf   : > { %s136_s23 = sshll.u32 %s2043_s22, 4  ;;  %s38_s25 = sadd.s32 1, %s2037_s13  ;;  %s137_s23 = int_to_ptr.vmem [resolvable:$true] %s136_s23 }
  0x10   : > { %p1832_p9 = pneg %p2121_p8  ;;  %s1914_s26 = scalar_lea.vmem %s137_s23, 256 }
  0x11   : > { %p1915_p13 = scmp.ne.s32.totalorder %s137_s23, %s1914_s26  ;;  %p1922_p5 = scmp.lt.s32.totalorder %s137_s23, %s137_s23 }
  0x12   : > { %p2130_p11 = pnand %p1832_p9, %p2101_p1  ;;  %p1923_p7 = scmp.lt.s32.totalorder %s1914_s26, %s1914_s26 }
  0x14   : > { %p1905_p12 = pneg %p2130_p11  ;;  %p1924_p6 = por %p1923_p7, %p1922_p5 }
  0x16   : > { %p1917_p0 = pnand %p1915_p13, %p1905_p12 }
  0x18   : > { %p1918_p3 = pneg %p1917_p0 }
  0x1a   : > { %p1925_p4 = pnand %p1924_p6, %p1918_p3 }
  0x1c   : > { %1928 = shalt.err (!%p1925_p4)
}
  0x1d   : > { %s2394_s27 = smov 128   ;;  %s2045_s28 = smov 8  }
  0x1e   : > { %1835 = dma.hbm_to_vmem [thread:$0]  (!%p2130_p11), %s2390_s0, 256, %s137_s23, [#allocation3], %s2394_s27, %s2394_s27, %s2045_s28  }
  0x1f   : > { %p40_p4 = scmp.ge.s32.totalorder %s38_s25, 2  ;;  %s70_s3 = sadd.s32 1, %s2029_s11 }
  0x20   : > { %p77_p6 = scmp.ne.s32.totalorder %s2029_s11, %s2025_s10  ;;  %p78_p9 = scmp.eq.s32.totalorder %s2041_s14, 0 }
  0x21   : > { %s2414_s25 = smov (%p40_p4, %s38_s25), 0  ;;  %p1845_p0 = scmp.lt.s32.totalorder %s2041_s14, 2 }
  0x22   : > { %p2151_p12 = por %p78_p9, %p77_p6  ;;  %p2157_p13 = por %p2105_p2, %p77_p6 }
  0x23   : > { %s63_s6 = ssub.s32 %s2037_s13, %s2414_s25  ;;  %s150_s7 = sand.u32 1, %s2029_s11  }
  0x24   : > { %p68_p11 = scmp.eq.s32.totalorder %s63_s6, 0  ;;  %s1606_s8 = sshll.u32 %s150_s7, 5 }
  0x25   : > { %s1630_s16 = sshll.u32 %s2037_s13, 9  ;;  %s154_s26 = scalar_lea.vmem [#allocation5], %s1606_s8 }
  0x26   : > { %s2166_s15 = scalar_select %p68_p11, %s2029_s11, %s70_s3  }
  0x27   : > { %s163_s24 = scalar_lea.hbm %s2391_s1, %s1630_s16  ;;  %s164_s29 = sshll.u32 %s154_s26, 4  ;;  %s165_s29 = int_to_ptr.vmem [resolvable:$true] %s164_s29 }
  0x28   : > { %p2174_p2 = pnand %p1845_p0, %p2151_p12  ;;  %s151_s30 = scalar_lea.sflag [#allocation6], %s150_s7 }
  0x29   : > { %s1942_s6 = scalar_lea.vmem %s165_s29, 512  ;;  %s2046_s3 = smov [#allocation5]  }
  0x2a   : > { %p1931_p3 = pneg %p2174_p2  ;;  %p1943_p5 = scmp.ne.s32.totalorder %s165_s29, %s1942_s6 }
  0x2b   : > { %s1947_s27 = sshll.u32 %s2046_s3, 4  ;;  %s1948_s27 = int_to_ptr.vmem [resolvable:$false] %s1947_s27 }
  0x2c   : > { %p1945_p7 = pnand %p1943_p5, %p1931_p3  ;;  %s1949_s16 = scalar_lea.vmem %s1948_s27, 1024 }
  0x2d   : > { %p1950_p6 = scmp.lt.s32.totalorder %s165_s29, %s1948_s27  ;;  %p1951_p9 = scmp.lt.s32.totalorder %s1949_s16, %s1942_s6 }
  0x2e   : > { %p1946_p4 = pneg %p1945_p7 }
  0x2f   : > { %p1952_p11 = por %p1951_p9, %p1950_p6 }
  0x31   : > { %p1953_p10 = pnand %p1952_p11, %p1946_p4 }
  0x33   : > { %1956 = shalt.err (!%p1953_p10)
}
  0x34   : > { %s2404_s4 = smov 128   ;;  %176 = sbr.rel (%p2121_p8) target bundleno = 542 (0x21e), region = 28 }
  0x35   : > { %1839 = dma.hbm_to_vmem [thread:$0]  (!%p2174_p2), %s163_s24, 512, %s165_s29, %s151_s30, %s2404_s4, %s2404_s4, %s2045_s28  }
  0x39   : > { %2008 = dma.done.wait (%p2101_p1), [#allocation3], 256  }
  0x3a   : > { %2010 = vsyncadd (%p2101_p1), [#allocation3], 4294967040  ;;  %s2192_s27 = sand.u32 1, %s2025_s10   ;;  %p2405_p10 = scmp.ne.s32.totalorder %s2397_s19, 0 }
  0x3b   : > { %s1611_s7 = sshll.u32 %s2192_s27, 5  ;;  %s183_s8 = scalar_lea.sflag [#allocation6], %s2192_s27 }
  0x3c   : > { %s186_s22 = scalar_lea.vmem [#allocation5], %s1611_s7 }
  0x3d   : > { %2012 = dma.done.wait (%p2405_p10), %s183_s8, 512  }
  0x3e   : > { %2014 = vsyncadd (%p2405_p10), %s183_s8, 4294966784  ;;  %vm215_vm0 = vcmask 130048   ;;  %v844_v0 = vld [vmem:[%s186_s22 + $0x10] sm:$0xff]  ;;  %v842_v1 = vld [vmem:[%s186_s22] sm:$0xff]  ;;  %s2047_s17 = smov 112   ;;  %s1612_s19 = sshll.u32 %s2192_s27, 7 }
  0x3f   : > { %v845_v2 = vld [vmem:[%s186_s22 + $0x18] sm:$0xff]  ;;  %854 = vrot.lane.b32.xlu1 %v844_v0, %s2047_s17  ;;  %850 = vrot.lane.b32.xlu0 %v842_v1, %s2047_s17  ;;  %v843_v3 = vld [vmem:[%s186_s22 + $0x8] sm:$0xff]  ;;  %v209_v5 = vld [vmem:[#allocation2] sm:$0xff]  ;;  %v217_v6 = vsel %vm215_vm0, %v842_v1, 0  ;;  %v223_v7 = vsel %vm215_vm0, %v844_v0, 0  ;;  %vm816_vm1 = vcmask 64512  }
  0x40   : > { %v210_v4 = vld [vmem:[#allocation2 + $0x8] sm:$0xff]  ;;  %v226_v8 = vsel %vm215_vm0, %v845_v2, 0  ;;  %v2205_v10 = vand.u32 4294901760, %v209_v5  ;;  %v2207_v11 = vand.u32 4294901760, %v217_v6  ;;  %v220_v12 = vsel %vm215_vm0, %v843_v3, 0  ;;  %s2293_s21 = scalar_lea.vmem [#allocation7], %s1612_s19 }
  0x41   : > { %v2203_v9 = vand.u32 4294901760, %v210_v4  ;;  %v2210_v13 = vand.u32 4294901760, %v220_v12  ;;  %v2212_v14 = vand.u32 4294901760, %v223_v7  ;;  %v2214_v15 = vand.u32 4294901760, %v226_v8  ;;  %s2048_s28 = smov 120   ;;  %s1631_s23 = sshll.u32 %s2033_s12, 11 }
  0x42   : > { %v296_v17 = vsub.f32 %v217_v6, %v2207_v11  ;;  %v2222_v18 = vsub.f32 %v209_v5, %v2205_v10  ;;  %1718 = vmatprep.mubr.f32.mxu1 %v2207_v11  ;;  %s1497_s24 = sshll.u32 %s2293_s21, 4  ;;  %s2336_s18 = scalar_lea.hbm %s2392_s2, %s1631_s23  ;;  %s2338_s24 = int_to_ptr.vmem [resolvable:$true] %s1497_s24 }
  0x43   : > { %1704 = vmatprep.subr.mxu0 %v2203_v9  ;;  %v2218_v16 = vsub.f32 %v210_v4, %v2203_v9  ;;  %856 = vrot.lane.b32.xlu1 %v845_v2, %s2047_s17  ;;  %v306_v19 = vsub.f32 %v220_v12, %v2210_v13  ;;  %v316_v20 = vsub.f32 %v223_v7, %v2212_v14  ;;  %s1481_s12 = scalar_lea.sflag [#allocation4], %s2192_s27  ;;  %s1957_s30 = scalar_lea.vmem %s2338_s24, 2048 }
  0x44   : > { %852 = vrot.lane.b32.xlu0 %v843_v3, %s2047_s17  ;;  %v326_v21 = vsub.f32 %v226_v8, %v2214_v15  ;;  %1705 = vmatpush3.msra.mxu0 %v2203_v9  ;;  %v297_v23 = vand.u32 4294901760, %v296_v17  ;;  %v2233_v24 = vand.u32 4294901760, %v2222_v18  ;;  %p1958_p1 = scmp.ne.s32.totalorder %s2338_s24, %s1957_s30  ;;  %s2049_s6 = smov [#allocation7]  }
  0x45   : > { %v2230_v22 = vand.u32 4294901760, %v2218_v16  ;;  %1706 = vmatprep.subr.mxu0 %v2205_v10  ;;  %v307_v25 = vand.u32 4294901760, %v306_v19  ;;  %v317_v26 = vand.u32 4294901760, %v316_v20  ;;  %s1961_s3 = sshll.u32 %s2049_s6, 4  ;;  %s1962_s3 = int_to_ptr.vmem [resolvable:$false] %s1961_s3 }
  0x46   : > { %v327_v27 = vand.u32 4294901760, %v326_v21  ;;  %1707 = vmatpush3.msra.mxu0 %v2205_v10  ;;  %v298_v29 = vsub.f32 %v296_v17, %v297_v23  ;;  %v374_v30 = vsub.f32 %v2222_v18, %v2233_v24  ;;  %p1959_p8 = pnand %p1958_p1, %p2157_p13  ;;  %s1963_s16 = scalar_lea.vmem %s1962_s3, 4096 }
  0x47   : > { %v367_v28 = vsub.f32 %v2218_v16, %v2230_v22  ;;  %v308_v31 = vsub.f32 %v306_v19, %v307_v25  ;;  %v318_v32 = vsub.f32 %v316_v20, %v317_v26  ;;  %1724 = vmatprep.subr.mxu0 %v2218_v16  ;;  %p1964_p0 = scmp.lt.s32.totalorder %s2338_s24, %s1962_s3  ;;  %p1965_p2 = scmp.lt.s32.totalorder %s1963_s16, %s1957_s30 }
  0x48   : > { %v328_v33 = vsub.f32 %v326_v21, %v327_v27  ;;  %v299_v35 = vand.u32 4294901760, %v298_v29  ;;  %v375_v36 = vand.u32 4294901760, %v374_v30  ;;  %p1960_p12 = pneg %p1959_p8 }
  0x49   : > { %v368_v34 = vand.u32 4294901760, %v367_v28  ;;  %v309_v37 = vand.u32 4294901760, %v308_v31  ;;  %v319_v38 = vand.u32 4294901760, %v318_v32  ;;  %p1966_p3 = por %p1965_p2, %p1964_p0 }
  0x4a   : > { %1708 = vmatprep.mubr.f32.mxu0 %v299_v35  ;;  %v329_v39 = vand.u32 4294901760, %v328_v33 }
  0x4b   : > { %1714 = vmatprep.subr.mxu1 %v368_v34  ;;  %1709 = vmatmul.mubr.f32.vlgmr.msra.gmra.mxu0 %v309_v37  ;;  %p1967_p5 = pnand %p1966_p3, %p1960_p12 }
  0x4c   : > { %1715 = vmatpush3.msra.mxu1 %v368_v34  ;;  %1711 = vmatprep.mubr.f32.mxu0 %v319_v38 }
  0x4d   : > { %1716 = vmatprep.subr.mxu1 %v375_v36  ;;  %1725 = vmatpush3.msra.mxu0 %v2218_v16 }
  0x4e   : > { %1717 = vmatpush3.msra.mxu1 %v375_v36  ;;  %1726 = vmatprep.subr.mxu0 %v2222_v18 }
  0x4f   : > { %1719 = vmatmul.mubr.f32.vlgmr.msra.gmra.mxu1 %v2210_v13  ;;  %1712 = vmatmul.mubr.f32.gmra.mxu0 %v329_v39 }
  0x50   : > { %1721 = vmatprep.mubr.f32.mxu1 %v2212_v14  ;;  %1734 = vmatprep.subr.mxu1 %v2203_v9 }
  0x51   : > { %1727 = vmatpush3.msra.mxu0 %v2222_v18  ;;  %1728 = vmatprep.mubr.f32.mxu0 %v296_v17 }
  0x52   : > { %1735 = vmatpush3.msra.mxu1 %v2203_v9  ;;  %1744 = vmatprep.subr.mxu0 %v2230_v22 }
  0x53   : > { %1722 = vmatmul.mubr.f32.gmra.mxu1 %v2214_v15  ;;  %1736 = vmatprep.subr.mxu1 %v2205_v10 }
  0x54   : > { %1729 = vmatmul.mubr.f32.vlgmr.msra.gmra.mxu0 %v306_v19  ;;  %1737 = vmatpush3.msra.mxu1 %v2205_v10 }
  0x55   : > { %1738 = vmatprep.mubr.f32.mxu1 %v297_v23  ;;  %1731 = vmatprep.mubr.f32.mxu0 %v316_v20 }
  0x56   : > { %1754 = vmatprep.subr.mxu1 %v2203_v9  ;;  %1745 = vmatpush3.msra.mxu0 %v2230_v22 }
  0x57   : > { %1739 = vmatmul.mubr.f32.vlgmr.msra.gmra.mxu1 %v307_v25  ;;  %1746 = vmatprep.subr.mxu0 %v2233_v24 }
  0x58   : > { %1732 = vmatmul.mubr.f32.gmra.mxu0 %v326_v21  ;;  %1741 = vmatprep.mubr.f32.mxu1 %v317_v26 }
  0x59   : > { %1748 = vmatprep.mubr.f32.mxu0 %v2207_v11  ;;  %1747 = vmatpush3.msra.mxu0 %v2233_v24 }
  0x5a   : > { %1755 = vmatpush3.msra.mxu1 %v2203_v9  ;;  %1764 = vmatprep.subr.mxu0 %v2203_v9 }
  0x5b   : > { %1742 = vmatmul.mubr.f32.gmra.mxu1 %v327_v27  ;;  %1756 = vmatprep.subr.mxu1 %v2205_v10 }
  0x5c   : > { %1749 = vmatmul.mubr.f32.vlgmr.msra.gmra.mxu0 %v2210_v13  ;;  %1757 = vmatpush3.msra.mxu1 %v2205_v10 }
  0x5d   : > { %1758 = vmatprep.mubr.f32.mxu1 %v2207_v11  ;;  %1751 = vmatprep.mubr.f32.mxu0 %v2212_v14 }
  0x5e   : > { %1774 = vmatprep.subr.mxu1 %v368_v34  ;;  %1765 = vmatpush3.msra.mxu0 %v2203_v9 }
  0x5f   : > { %1759 = vmatmul.mubr.f32.vlgmr.msra.gmra.mxu1 %v2210_v13  ;;  %1766 = vmatprep.subr.mxu0 %v2205_v10 }
  0x60   : > { %1752 = vmatmul.mubr.f32.gmra.mxu0 %v2214_v15  ;;  %1761 = vmatprep.mubr.f32.mxu1 %v2212_v14 }
  0x61   : > { %1775 = vmatpush3.msra.mxu1 %v368_v34  ;;  %1767 = vmatpush3.msra.mxu0 %v2205_v10 }
  0x62   : > { %1776 = vmatprep.subr.mxu1 %v375_v36  ;;  %1784 = vmatprep.subr.mxu0 %v2218_v16 }
  0x63   : > { %1762 = vmatmul.mubr.f32.gmra.mxu1 %v2214_v15 }
  0x64   : > { %1777 = vmatpush3.msra.mxu1 %v375_v36 }
  0x65   : > { %1794 = vmatprep.subr.mxu1 %v2203_v9 }
  0xb1   : > { %v855_v40 = vpop.permute.xlu1 %854  ;;  %v851_v41 = vpop.permute.xlu0 %850 }
  0xb2   : > { %v862_v42 = vsel %vm215_vm0, %v855_v40, 0  ;;  %v858_v43 = vsel %vm215_vm0, %v851_v41, 0 }
  0xb3   : > { %v953_v44 = vand.u32 4294901760, %v862_v42  ;;  %v933_v45 = vand.u32 4294901760, %v858_v43 }
  0xb5   : > { %v954_v46 = vsub.f32 %v862_v42, %v953_v44  ;;  %v934_v47 = vsub.f32 %v858_v43, %v933_v45  ;;  %v857_v48 = vpop.permute.xlu1 %856  ;;  %1778 = vmatprep.mubr.f32.mxu1 %v933_v45 }
  0xb6   : > { %v853_v49 = vpop.permute.xlu0 %852  ;;  %v864_v50 = vsel %vm215_vm0, %v857_v48, 0 }
  0xb7   : > { %v860_v51 = vsel %vm215_vm0, %v853_v49, 0  ;;  %v935_v52 = vand.u32 4294901760, %v934_v47  ;;  %v963_v53 = vand.u32 4294901760, %v864_v50  ;;  %v955_v55 = vand.u32 4294901760, %v954_v46 }
  0xb8   : > { %v943_v54 = vand.u32 4294901760, %v860_v51 }
  0xb9   : > { %v964_v56 = vsub.f32 %v864_v50, %v963_v53  ;;  %v936_v58 = vsub.f32 %v934_v47, %v935_v52  ;;  %v956_v62 = vsub.f32 %v954_v46, %v955_v55 }
  0xba   : > { %v944_v57 = vsub.f32 %v860_v51, %v943_v54  ;;  %1779 = vmatmul.mubr.f32.vlgmr.msra.gmra.mxu1 %v943_v54 }
  0xbb   : > { %1781 = vmatprep.mubr.f32.mxu1 %v953_v44  ;;  %1795 = vmatpush3.msra.mxu1 %v2203_v9  ;;  %v965_v59 = vand.u32 4294901760, %v964_v56  ;;  %v937_v61 = vand.u32 4294901760, %v936_v58  ;;  %v957_v2 = vand.u32 4294901760, %v956_v62 }
  0xbc   : > { %v945_v60 = vand.u32 4294901760, %v944_v57  ;;  %1796 = vmatprep.subr.mxu1 %v2205_v10 }
  0xbd   : > { %1797 = vmatpush3.msra.mxu1 %v2205_v10  ;;  %1768 = vmatprep.mubr.f32.mxu0 %v937_v61  ;;  %v966_v1 = vsub.f32 %v964_v56, %v965_v59 }
  0xbe   : > { %v946_v63 = vsub.f32 %v944_v57, %v945_v60  ;;  %1782 = vmatmul.mubr.f32.gmra.mxu1 %v963_v53  ;;  %1814 = vmatprep.subr.mxu1 %v2203_v9 }
  0xbf   : > { %1798 = vmatprep.mubr.f32.mxu1 %v935_v52  ;;  %v967_v3 = vand.u32 4294901760, %v966_v1 }
  0xc0   : > { %v947_v0 = vand.u32 4294901760, %v946_v63 }
  0xc2   : > { %1769 = vmatmul.mubr.f32.vlgmr.msra.gmra.mxu0 %v947_v0  ;;  %1799 = vmatmul.mubr.f32.vlgmr.msra.gmra.mxu1 %v945_v60 }
  0xc3   : > { %1785 = vmatpush3.msra.mxu0 %v2218_v16  ;;  %1771 = vmatprep.mubr.f32.mxu0 %v957_v2 }
  0xc4   : > { %1801 = vmatprep.mubr.f32.mxu1 %v955_v55  ;;  %1786 = vmatprep.subr.mxu0 %v2222_v18 }
  0xc5   : > { %1787 = vmatpush3.msra.mxu0 %v2222_v18  ;;  %1815 = vmatpush3.msra.mxu1 %v2203_v9 }
  0xc6   : > { %1772 = vmatmul.mubr.f32.gmra.mxu0 %v967_v3  ;;  %1802 = vmatmul.mubr.f32.gmra.mxu1 %v965_v59 }
  0xc7   : > { %1788 = vmatprep.mubr.f32.mxu0 %v934_v47  ;;  %1818 = vmatprep.mubr.f32.mxu1 %v933_v45 }
  0xc8   : > { %1816 = vmatprep.subr.mxu1 %v2205_v10  ;;  %1804 = vmatprep.subr.mxu0 %v2230_v22 }
  0xc9   : > { %1817 = vmatpush3.msra.mxu1 %v2205_v10 }
  0xca   : > { %1789 = vmatmul.mubr.f32.vlgmr.msra.gmra.mxu0 %v944_v57  ;;  %1819 = vmatmul.mubr.f32.vlgmr.msra.gmra.mxu1 %v943_v54 }
  0xcb   : > { %1805 = vmatpush3.msra.mxu0 %v2230_v22  ;;  %1791 = vmatprep.mubr.f32.mxu0 %v954_v46 }
  0xcc   : > { %1821 = vmatprep.mubr.f32.mxu1 %v953_v44  ;;  %1806 = vmatprep.subr.mxu0 %v2233_v24 }
  0xcd   : > { %1807 = vmatpush3.msra.mxu0 %v2233_v24 }
  0xce   : > { %1792 = vmatmul.mubr.f32.gmra.mxu0 %v964_v56  ;;  %1822 = vmatmul.mubr.f32.gmra.mxu1 %v963_v53 }
  0xcf   : > { %1808 = vmatprep.mubr.f32.mxu0 %v933_v45 }
  0xd2   : > { %1809 = vmatmul.mubr.f32.vlgmr.msra.gmra.mxu0 %v943_v54 }
  0xd3   : > { %1811 = vmatprep.mubr.f32.mxu0 %v953_v44 }
  0xd6   : > { %1812 = vmatmul.mubr.f32.gmra.mxu0 %v963_v53 }
 0x10b   : > { %v1710_v4 = vpop.f32.mrf.mxu0 }
 0x10d   : > { %v301_v5 = vpop.f32.mrf.mxu0 }
 0x10f   : > { %v1720_v6 = vpop.f32.mrf.mxu1  ;;  %v1713_v7 = vpop.f32.mrf.mxu0 }
 0x110   : > { %v419_v8 = vadd.f32 %v1720_v6, %v1710_v4 }
 0x111   : > { %v412_v9 = vpop.f32.mrf.mxu1  ;;  %v321_v10 = vpop.f32.mrf.mxu0 }
 0x112   : > { %v413_v11 = vadd.f32 %v412_v9, %v301_v5 }
 0x113   : > { %v1723_v12 = vpop.f32.mrf.mxu1 }
 0x114   : > { %v1730_v13 = vpop.f32.mrf.mxu0  ;;  %v431_v14 = vadd.f32 %v1723_v12, %v1713_v7 }
 0x115   : > { %v424_v15 = vpop.f32.mrf.mxu1  ;;  %v514_v16 = vadd.f32 %v1730_v13, %v419_v8 }
 0x116   : > { %v506_v17 = vpop.f32.mrf.mxu0  ;;  %v425_v18 = vadd.f32 %v424_v15, %v321_v10 }
 0x117   : > { %v507_v19 = vadd.f32 %v506_v17, %v413_v11  ;;  %v1740_v20 = vpop.f32.mrf.mxu1 }
 0x118   : > { %v1733_v21 = vpop.f32.mrf.mxu0  ;;  %v611_v22 = vadd.f32 %v1740_v20, %v514_v16 }
 0x119   : > { %v528_v23 = vadd.f32 %v1733_v21, %v431_v14  ;;  %v602_v24 = vpop.f32.mrf.mxu1 }
 0x11a   : > { %v520_v25 = vpop.f32.mrf.mxu0  ;;  %v603_v26 = vadd.f32 %v602_v24, %v507_v19 }
 0x11b   : > { %v521_v27 = vadd.f32 %v520_v25, %v425_v18  ;;  %v1743_v28 = vpop.f32.mrf.mxu1 }
 0x11c   : > { %v1750_v29 = vpop.f32.mrf.mxu0  ;;  %v627_v30 = vadd.f32 %v1743_v28, %v528_v23 }
 0x11d   : > { %v618_v31 = vpop.f32.mrf.mxu1  ;;  %v710_v32 = vadd.f32 %v1750_v29, %v611_v22 }
 0x11e   : > { %v703_v33 = vpop.f32.mrf.mxu0  ;;  %v619_v34 = vadd.f32 %v618_v31, %v521_v27 }
 0x11f   : > { %v704_v35 = vadd.f32 %v703_v33, %v603_v26  ;;  %v1760_v36 = vpop.f32.mrf.mxu1 }
 0x120   : > { %v801_v37 = vadd.f32 %v1760_v36, %v710_v32  ;;  %v1753_v38 = vpop.f32.mrf.mxu0 }
 0x121   : > { %v722_v39 = vadd.f32 %v1753_v38, %v627_v30  ;;  %v794_v40 = vpop.f32.mrf.mxu1 }
 0x122   : > { %818 = vst.msk [vmem:[%s2293_s21 + $0x8] sm:$0xff] %vm816_vm1, %v801_v37  ;;  %v795_v41 = vadd.f32 %v794_v40, %v704_v35  ;;  %v715_v42 = vpop.f32.mrf.mxu0  ;;  %827 = vrot.lane.b32.xlu1 %v801_v37, %s2048_s28 }
 0x123   : > { %v716_v43 = vadd.f32 %v715_v42, %v619_v34  ;;  %v1763_v44 = vpop.f32.mrf.mxu1 }
 0x124   : > { %817 = vst.msk [vmem:[%s2293_s21] sm:$0xff] %vm816_vm1, %v795_v41  ;;  %v813_v45 = vadd.f32 %v1763_v44, %v722_v39  ;;  %825 = vrot.lane.b32.xlu0 %v795_v41, %s2048_s28 }
 0x125   : > { %v806_v46 = vpop.f32.mrf.mxu1 }
 0x126   : > { %820 = vst.msk [vmem:[%s2293_s21 + $0x18] sm:$0xff] %vm816_vm1, %v813_v45  ;;  %v807_v47 = vadd.f32 %v806_v46, %v716_v43  ;;  %831 = vrot.lane.b32.xlu1 %v813_v45, %s2048_s28 }
 0x128   : > { %819 = vst.msk [vmem:[%s2293_s21 + $0x10] sm:$0xff] %vm816_vm1, %v807_v47  ;;  %829 = vrot.lane.b32.xlu0 %v807_v47, %s2048_s28 }
 0x17a   : > { %v1780_v48 = vpop.f32.mrf.mxu1 }
 0x17c   : > { %v1050_v49 = vpop.f32.mrf.mxu1 }
 0x17e   : > { %v1783_v50 = vpop.f32.mrf.mxu1 }
 0x180   : > { %v1062_v51 = vpop.f32.mrf.mxu1 }
 0x182   : > { %v1770_v52 = vpop.f32.mrf.mxu0  ;;  %v1800_v53 = vpop.f32.mrf.mxu1 }
 0x183   : > { %v1057_v61 = vadd.f32 %v1780_v48, %v1770_v52 }
 0x184   : > { %v939_v54 = vpop.f32.mrf.mxu0  ;;  %v1240_v55 = vpop.f32.mrf.mxu1 }
 0x185   : > { %v1051_v63 = vadd.f32 %v1050_v49, %v939_v54 }
 0x186   : > { %v1773_v56 = vpop.f32.mrf.mxu0  ;;  %v1803_v57 = vpop.f32.mrf.mxu1 }
 0x187   : > { %v1069_v3 = vadd.f32 %v1783_v50, %v1773_v56 }
 0x188   : > { %v959_v58 = vpop.f32.mrf.mxu0  ;;  %v1256_v59 = vpop.f32.mrf.mxu1 }
 0x189   : > { %v1063_v6 = vadd.f32 %v1062_v51, %v959_v58 }
 0x18a   : > { %v1790_v60 = vpop.f32.mrf.mxu0  ;;  %v1820_v1 = vpop.f32.mrf.mxu1 }
 0x18b   : > { %v1152_v0 = vadd.f32 %v1790_v60, %v1057_v61 }
 0x18c   : > { %v1144_v62 = vpop.f32.mrf.mxu0  ;;  %v1432_v7 = vpop.f32.mrf.mxu1 }
 0x18d   : > { %v1145_v4 = vadd.f32 %v1144_v62, %v1051_v63  ;;  %v1249_v9 = vadd.f32 %v1800_v53, %v1152_v0 }
 0x18e   : > { %v1793_v2 = vpop.f32.mrf.mxu0  ;;  %v1823_v16 = vpop.f32.mrf.mxu1 }
 0x18f   : > { %v1166_v8 = vadd.f32 %v1793_v2, %v1069_v3  ;;  %v1241_v13 = vadd.f32 %v1240_v55, %v1145_v4 }
 0x190   : > { %v1158_v5 = vpop.f32.mrf.mxu0  ;;  %v1444_v29 = vpop.f32.mrf.mxu1 }
 0x191   : > { %v1159_v11 = vadd.f32 %v1158_v5, %v1063_v6  ;;  %v1265_v19 = vadd.f32 %v1803_v57, %v1166_v8 }
 0x192   : > { %v1810_v10 = vpop.f32.mrf.mxu0 }
 0x193   : > { %v1348_v12 = vadd.f32 %v1810_v10, %v1249_v9  ;;  %v1257_v24 = vadd.f32 %v1256_v59, %v1159_v11 }
 0x194   : > { %v1341_v14 = vpop.f32.mrf.mxu0  ;;  %v828_v15 = vpop.permute.xlu1 %827 }
 0x195   : > { %v1439_v17 = vadd.f32 %v1820_v1, %v1348_v12  ;;  %v1342_v18 = vadd.f32 %v1341_v14, %v1241_v13  ;;  %1614 = vst.msk [vmem:[%s2293_s21 + $0x28] sm:$0xff] %vm816_vm1, %v828_v15 }
 0x196   : > { %v1813_v20 = vpop.f32.mrf.mxu0  ;;  %v826_v21 = vpop.permute.xlu0 %825 }
 0x197   : > { %1618 = vst.msk [vmem:[%s2293_s21 + $0x48] sm:$0xff] %vm816_vm1, %v1439_v17  ;;  %v1433_v22 = vadd.f32 %v1432_v7, %v1342_v18  ;;  %v1360_v23 = vadd.f32 %v1813_v20, %v1265_v19  ;;  %1465 = vrot.lane.b32.xlu1 %v1439_v17, %s2048_s28  ;;  %1613 = vst.msk [vmem:[%s2293_s21 + $0x20] sm:$0xff] %vm816_vm1, %v826_v21 }
 0x198   : > { %v1353_v25 = vpop.f32.mrf.mxu0  ;;  %v832_v26 = vpop.permute.xlu1 %831 }
 0x199   : > { %1617 = vst.msk [vmem:[%s2293_s21 + $0x40] sm:$0xff] %vm816_vm1, %v1433_v22  ;;  %v1451_v27 = vadd.f32 %v1823_v16, %v1360_v23  ;;  %v1354_v28 = vadd.f32 %v1353_v25, %v1257_v24  ;;  %1463 = vrot.lane.b32.xlu0 %v1433_v22, %s2048_s28  ;;  %1616 = vst.msk [vmem:[%s2293_s21 + $0x38] sm:$0xff] %vm816_vm1, %v832_v26 }
 0x19a   : > { %v830_v30 = vpop.permute.xlu0 %829 }
 0x19b   : > { %1620 = vst.msk [vmem:[%s2293_s21 + $0x58] sm:$0xff] %vm816_vm1, %v1451_v27  ;;  %v1445_v31 = vadd.f32 %v1444_v29, %v1354_v28  ;;  %1469 = vrot.lane.b32.xlu1 %v1451_v27, %s2048_s28  ;;  %1615 = vst.msk [vmem:[%s2293_s21 + $0x30] sm:$0xff] %vm816_vm1, %v830_v30 }
 0x19d   : > { %1619 = vst.msk [vmem:[%s2293_s21 + $0x50] sm:$0xff] %vm816_vm1, %v1445_v31  ;;  %1467 = vrot.lane.b32.xlu0 %v1445_v31, %s2048_s28 }
 0x209   : > { %v1466_v32 = vpop.permute.xlu1 %1465 }
 0x20a   : > { %1622 = vst.msk [vmem:[%s2293_s21 + $0x68] sm:$0xff] %vm816_vm1, %v1466_v32 }
 0x20b   : > { %v1464_v33 = vpop.permute.xlu0 %1463 }
 0x20c   : > { %1621 = vst.msk [vmem:[%s2293_s21 + $0x60] sm:$0xff] %vm816_vm1, %v1464_v33 }
 0x20d   : > { %v1470_v34 = vpop.permute.xlu1 %1469 }
 0x20e   : > { %1624 = vst.msk [vmem:[%s2293_s21 + $0x78] sm:$0xff] %vm816_vm1, %v1470_v34 }
 0x20f   : > { %v1468_v35 = vpop.permute.xlu0 %1467 }
 0x210   : > { %1623 = vst.msk [vmem:[%s2293_s21 + $0x70] sm:$0xff] %vm816_vm1, %v1468_v35 }
 0x211   : > { %1970 = shalt.err (!%p1967_p5)
}
 0x212   : > { %s1971_s4 = scalar_lea.hbm %s2336_s18, 2048  ;;  %s1975_s22 = scalar_lea.hbm %s2392_s2, 4096 }
 0x213   : > { %p1972_p7 = scmp.ne.s32.totalorder %s2336_s18, %s1971_s4  ;;  %p1976_p9 = scmp.lt.s32.totalorder %s2336_s18, %s2392_s2 }
 0x214   : > { %p1977_p11 = scmp.lt.s32.totalorder %s1975_s22, %s1971_s4 }
 0x215   : > { %p1973_p4 = pnand %p1972_p7, %p2157_p13 }
 0x216   : > { %p1978_p10 = por %p1977_p11, %p1976_p9 }
 0x217   : > { %p1974_p6 = pneg %p1973_p4 }
 0x219   : > { %p1979_p1 = pnand %p1978_p10, %p1974_p6 }
 0x21b   : > { %1982 = shalt.err (!%p1979_p1)
}
 0x21c   : > { %s2050_s21 = smov 128   ;;  %s2051_s28 = smov 8  }
 0x21d   : > { %1830 = dma.vmem_to_hbm [thread:$0]  (%p2157_p13), %s2338_s24, 2048, %s2336_s18, %s1481_s12, %s2050_s21, %s2050_s21, %s2051_s28  }
 0x21e PF: > { %s1512_s23 = sand.u32 1, %s2021_s9   ;;  %p2406_p8 = scmp.ne.s32.totalorder %s2398_s20, 0 }
 0x21f   : > { %p2407_p12 = scmp.ge.s32.totalorder %s2041_s14, 2  ;;  %s1513_s26 = scalar_lea.sflag [#allocation4], %s1512_s23 }
 0x221   : > { %p1841_p0 = pnand %p2407_p12, %p2406_p8 }
 0x223   : > { %p1842_p2 = pneg %p1841_p0 }
 0x225   : > { %2016 = dma.done.wait (%p1842_p2), %s1513_s26, 2048  }
 0x226   : > { %2018 = vsyncadd (%p1842_p2), %s1513_s26, 4294965248  ;;  %s19_s14 = sadd.s32 1, %s2041_s14   ;;  %s2408_s9 = smov %s2025_s10 }
 0x227   : > { %p16_p3 = scmp.ge.s32.totalorder %s19_s14, 4   ;;  %s2409_s10 = smov %s2029_s11 }
 0x228   : > { %s2410_s11 = smov %s2166_s15  ;;  %s2411_s12 = smov %s2037_s13 }
 0x229   : > { %s2412_s13 = smov %s2414_s25  ;;  %18 = sbr.rel (!%p16_p3) target bundleno = 7 (0x7), region = 81 }
 0x22e   :  { %1518 = vsyncpa [#allocation3], 1 }
 0x22f   :  { %1520 = vsyncpa [#allocation3 + $0x1], 1 }
 0x230   :  { %1521 = vsyncpa [#allocation6], 1 }
 0x231   :  { %1523 = vsyncpa [#allocation6 + $0x1], 1 }
 0x232   :  { %1524 = vsyncpa [#allocation4], 1 }
 0x233   :  { %1526 = vsyncpa [#allocation4 + $0x1], 1 }

</bundles_post_ra>
